<compile_context>
chip_gen: v5e
topology: v5e:2x2
jax: 0.10.0
libtpu: 0.0.40
codegen_flags: <defaults>
</compile_context>

<pallas_src>
import functools

import jax
import jax.numpy as jnp
import numpy as np
from jax.experimental import pallas as pl
from jax.experimental.pallas import tpu as pltpu


# --------------------------------------------------------------------------
# Kernel 1: per-sample cross entropy with ignore_index=-1 (online logsumexp)
# --------------------------------------------------------------------------
def _ce_kernel(logits_ref, tgt_ref, raw_ref, m_sc, l_sc, t_sc):
    k = pl.program_id(1)
    nk = pl.num_programs(1)

    x = logits_ref[...].astype(jnp.float32)        # (TB, TC), cast in VMEM
    tgt = tgt_ref[...]                             # (TB, 1) int32
    TB, TC = x.shape

    # one-hot gather of the target logit, folded into the C-tile loop
    col = jax.lax.broadcasted_iota(jnp.int32, (TB, TC), 1) + k * TC
    onehot = col == tgt                            # never true for tgt == -1
    t_blk = jnp.sum(jnp.where(onehot, x, 0.0), axis=1, keepdims=True)
    m_blk = jnp.max(x, axis=1, keepdims=True)

    @pl.when(k == 0)
    def _():
        m_sc[...] = jnp.full(m_sc.shape, -jnp.inf, dtype=jnp.float32)
        l_sc[...] = jnp.zeros(l_sc.shape, dtype=jnp.float32)
        t_sc[...] = jnp.zeros(t_sc.shape, dtype=jnp.float32)

    # online logsumexp update
    m_old = m_sc[...]
    m_new = jnp.maximum(m_old, m_blk)
    alpha = jnp.exp(m_old - m_new)                 # == 0 at k == 0
    l_sc[...] = l_sc[...] * alpha + jnp.sum(jnp.exp(x - m_new),
                                            axis=1, keepdims=True)
    m_sc[...] = m_new
    t_sc[...] = t_sc[...] + t_blk

    @pl.when(k == nk - 1)
    def _():
        lse = jnp.log(l_sc[...]) + m_sc[...]
        raw = lse - t_sc[...]
        raw = jnp.where(tgt == -1, 0.0, raw)       # ignore_index contributes 0
        raw_ref[...] = raw


# --------------------------------------------------------------------------
# Kernel 2: MIL selection (first-argmin / first-argmax per label) + reduce
# --------------------------------------------------------------------------
def _mil_select_kernel(raw_col_ref, tgt_col_ref, raw_row_ref, tgt_row_ref,
                       out_ref, viol_sc, earl_sc, *, mode, size_average):
    j = pl.program_id(0)
    nj = pl.num_programs(0)

    @pl.when(j == 0)
    def _():
        viol_sc[...] = jnp.zeros(viol_sc.shape, dtype=jnp.int32)
        earl_sc[...] = jnp.zeros(earl_sc.shape, dtype=jnp.int32)

    tcol = tgt_col_ref[...]                        # (B, 1)   int32
    trow = tgt_row_ref[...]                        # (1, TBJ) int32
    li = raw_col_ref[...]                          # (B, 1)   f32
    lj = raw_row_ref[...]                          # (1, TBJ) f32
    B = tcol.shape[0]
    TBJ = trow.shape[1]

    ii = jax.lax.broadcasted_iota(jnp.int32, (B, TBJ), 0)
    jj = jax.lax.broadcasted_iota(jnp.int32, (B, TBJ), 1) + j * TBJ

    same = tcol == trow                            # (B, TBJ)
    lt = jj < ii
    if mode == 'min':
        prec = (lj < li) | ((lj == li) & lt)       # j precludes i (first-argmin)
    else:  # 'max'
        prec = (lj > li) | ((lj == li) & lt)       # j precludes i (first-argmax)

    # Fused single pass: count violations and earlier-same-label samples.
    viol_sc[...] += jnp.sum((same & prec).astype(jnp.int32),
                            axis=1, keepdims=True)
    earl_sc[...] += jnp.sum((same & lt).astype(jnp.int32),
                            axis=1, keepdims=True)

    @pl.when(j == nj - 1)
    def _():
        mask = (viol_sc[...] == 0).astype(jnp.float32)   # selected samples
        first = (earl_sc[...] == 0).astype(jnp.float32)  # first occ. per label
        label_size = jnp.sum(first)                      # number of unique labels
        sum_loss = jnp.sum(li * mask)
        if size_average:
            out = sum_loss / label_size
        else:
            out = sum_loss
        out_ref[0, 0] = out


# --------------------------------------------------------------------------
# Kernel 3: mode == 'mean'
# --------------------------------------------------------------------------
def _mean_kernel(raw_ref, out_ref, *, size_average):
    raw = raw_ref[...]
    s = jnp.sum(raw)
    if size_average:
        s = s / jnp.float32(raw.shape[0])
    out_ref[0, 0] = s


# --------------------------------------------------------------------------
# Tiling helper: largest multiple of `base` dividing n, <= pref, else full n.
# Keeps every block shape either a multiple of (8, 128) or full-extent.
# --------------------------------------------------------------------------
def _pick_tile(n, base, pref):
    best = None
    t = base
    limit = min(n, pref)
    while t <= limit:
        if n % t == 0:
            best = t
        t += base
    return best if best is not None else n


# --------------------------------------------------------------------------
# Wrapper
# --------------------------------------------------------------------------
def mil_loss(logits, targets, mode='min', size_average=True, reduce=True,
             tb=None, tc=None):
    """logits: (B, C) float (any dtype), targets: (B,) int. Returns scalar f32."""
    if mode not in ('max', 'min', 'mean'):
        raise NotImplementedError('Not Implement Mode in MIL: %s' % mode)
    if not reduce:
        # TODO(synk): reduce=False (per-sample output) not implemented.
        raise NotImplementedError('reduce=False not implemented')

    B, C = logits.shape
    tgt_col = targets.astype(jnp.int32).reshape(B, 1)

    # Tile sizes sized for v7x's smaller VMEM (<= 256x1024 per input tile,
    # ~1 MiB f32 / 0.5 MiB bf16 per buffer, double-buffered).
    TB = tb if tb is not None else _pick_tile(B, 8, 256)
    TC = tc if tc is not None else _pick_tile(C, 128, 1024)
    nb, nc = B // TB, C // TC

    itemsize = jnp.dtype(logits.dtype).itemsize
    cost = pl.CostEstimate(flops=4 * B * C,
                           transcendentals=B * C,
                           bytes_accessed=B * C * itemsize + 2 * B * 4)

    # ---- phase 1: per-sample raw cross-entropy losses (streamed) ----
    raw = pl.pallas_call(
        _ce_kernel,
        out_shape=jax.ShapeDtypeStruct((B, 1), jnp.float32),
        grid_spec=pltpu.PrefetchScalarGridSpec(
            num_scalar_prefetch=0,
            grid=(nb, nc),
            in_specs=[
                pl.BlockSpec((TB, TC), lambda i, k: (i, k)),   # logits, native dtype
                pl.BlockSpec((TB, 1), lambda i, k: (i, 0)),    # targets
            ],
            out_specs=pl.BlockSpec((TB, 1), lambda i, k: (i, 0)),
            scratch_shapes=[pltpu.VMEM((TB, 1), jnp.float32),  # running max
                            pltpu.VMEM((TB, 1), jnp.float32),  # running sum
                            pltpu.VMEM((TB, 1), jnp.float32)], # target logit
        ),
        compiler_params=pltpu.CompilerParams(
            dimension_semantics=("parallel", "arbitrary")),
        cost_estimate=cost,
    )(logits, tgt_col)        # NOTE: no host-side f32 up-cast of logits

    # ---- phase 2: reduction ----
    if mode == 'mean':
        out = pl.pallas_call(
            functools.partial(_mean_kernel, size_average=size_average),
            out_shape=jax.ShapeDtypeStruct((1, 1), jnp.float32),
            grid=(1,),
            in_specs=[pl.BlockSpec((B, 1), lambda i: (0, 0))],
            out_specs=pl.BlockSpec((1, 1), lambda i: (0, 0)),
            compiler_params=pltpu.CompilerParams(
                dimension_semantics=("arbitrary",)),
        )(raw)
        return out[0, 0]

    # lane-major copies so no in-kernel transposes are needed (tiny arrays)
    raw_row = raw.reshape(1, B)
    tgt_row = tgt_col.reshape(1, B)

    TBJ = _pick_tile(B, 128, 256)   # column tiling of the (B, B) comparison
    nj = B // TBJ

    out = pl.pallas_call(
        functools.partial(_mil_select_kernel, mode=mode,
                          size_average=size_average),
        out_shape=jax.ShapeDtypeStruct((1, 1), jnp.float32),
        grid_spec=pltpu.PrefetchScalarGridSpec(
            num_scalar_prefetch=0,
            grid=(nj,),
            in_specs=[
                pl.BlockSpec((B, 1), lambda j: (0, 0)),     # raw (col)
                pl.BlockSpec((B, 1), lambda j: (0, 0)),     # tgt (col)
                pl.BlockSpec((1, TBJ), lambda j: (0, j)),   # raw (row tile)
                pl.BlockSpec((1, TBJ), lambda j: (0, j)),   # tgt (row tile)
            ],
            out_specs=pl.BlockSpec((1, 1), lambda j: (0, 0)),
            scratch_shapes=[pltpu.VMEM((B, 1), jnp.int32),   # violation count
                            pltpu.VMEM((B, 1), jnp.int32)],  # earlier-same count
        ),
        compiler_params=pltpu.CompilerParams(
            dimension_semantics=("arbitrary",)),
    )(raw, tgt_col, raw_row, tgt_row)
    return out[0, 0]


# --------------------------------------------------------------------------
# Pure numpy reference matching the PyTorch module
# --------------------------------------------------------------------------
def _reference_mil_loss(logits, targets, mode='min', size_average=True):
    logits = np.asarray(logits).astype(np.float32)
    t = np.asarray(targets, dtype=np.int64)
    B, C = logits.shape
    m = logits.max(axis=1, keepdims=True)
    lse = np.log(np.exp(logits - m).sum(axis=1, keepdims=True)) + m
    raw = np.zeros(B, dtype=np.float32)
    for i in range(B):
        if t[i] == -1:
            raw[i] = 0.0
        else:
            raw[i] = lse[i, 0] - logits[i, t[i]]
    label_set = set(t.tolist())
    if mode == 'mean':
        return raw.mean() if size_average else raw.sum()
    mask = np.zeros(B, dtype=np.float32)
    for label in label_set:
        sl = np.where(t == label)[0]
        vals = raw[sl]
        idx = int(np.argmax(vals)) if mode == 'max' else int(np.argmin(vals))
        mask[sl[idx]] = 1.0
    s = float((raw * mask).sum())
    return s / float(len(label_set)) if size_average else s


if __name__ == "__main__":
    key = jax.random.PRNGKey(0)

    # --- small case (single tile in every axis) ---
    B, C = 8, 16
    k0, k1, k2 = jax.random.split(key, 3)
    logits = jax.random.normal(k0, (B, C), dtype=jnp.float32)
    targets = jnp.array([0, 1, 0, 2, 1, 2, 0, 3], dtype=jnp.int32)
    targets_ign = jnp.array([0, 1, 0, -1, 1, 2, 0, 3], dtype=jnp.int32)

    for mode, tgt in [('min', targets), ('max', targets_ign),
                      ('mean', targets_ign)]:
        out = mil_loss(logits, tgt, mode=mode, size_average=True)
        out = jax.block_until_ready(out)
        ref = _reference_mil_loss(np.array(logits), np.array(tgt),
                                  mode=mode, size_average=True)
        assert np.allclose(float(out), ref, rtol=1e-5, atol=1e-5), \
            (mode, float(out), ref)

    # --- slightly larger case exercising the multi-tile online-LSE path ---
    B2, C2 = 16, 256
    logits2 = jax.random.normal(k1, (B2, C2), dtype=jnp.float32)
    targets2 = jax.random.randint(k2, (B2,), 0, C2, dtype=jnp.int32)
    out2 = mil_loss(logits2, targets2, mode='min', size_average=True,
                    tb=8, tc=128)                      # nb=2, nc=2
    out2 = jax.block_until_ready(out2)
    ref2 = _reference_mil_loss(np.array(logits2), np.array(targets2),
                               mode='min', size_average=True)
    assert np.allclose(float(out2), ref2, rtol=1e-5, atol=1e-5), \
        (float(out2), ref2)

    print("KERNEL_OK")
</pallas_src>

<mosaic_0001>
module attributes {stable_mosaic.version = 11 : i64} {
  func.func @_ce_kernel(%arg0: i32, %arg1: i32, %arg2: memref<8x16xf32, #tpu.memory_space<vmem>>, %arg3: memref<8x1xi32, #tpu.memory_space<vmem>>, %arg4: memref<8x1xf32, #tpu.memory_space<vmem>>, %arg5: memref<8x1xf32, #tpu.memory_space<vmem>>, %arg6: memref<8x1xf32, #tpu.memory_space<vmem>>, %arg7: memref<8x1xf32, #tpu.memory_space<vmem>>) attributes {dimension_semantics = [#tpu.dimension_semantics<parallel>, #tpu.dimension_semantics<arbitrary>], iteration_bounds = array<i64: 1, 1>, scalar_prefetch = 0 : i64, scratch_operands = 3 : i64, tpu.core_type = #tpu.core_type<tc>, window_params = [{transform_indices = @transform_0, window_bounds = array<i64: 8, 16>}, {transform_indices = @transform_1, window_bounds = array<i64: 8, 1>}, {transform_indices = @transform_2, window_bounds = array<i64: 8, 1>}]} {
    %c0 = arith.constant 0 : index
    %c0_0 = arith.constant 0 : index
    %0 = vector.load %arg2[%c0, %c0_0] : memref<8x16xf32, #tpu.memory_space<vmem>>, vector<8x16xf32>
    %c0_1 = arith.constant 0 : index
    %c0_2 = arith.constant 0 : index
    %1 = vector.load %arg3[%c0_1, %c0_2] : memref<8x1xi32, #tpu.memory_space<vmem>>, vector<8x1xi32>
    %2 = tpu.iota {dimensions = array<i32: 1>} : vector<8x16xi32>
    %c16_i32 = arith.constant 16 : i32
    %3 = arith.muli %arg1, %c16_i32 : i32
    %4 = vector.broadcast %3 : i32 to vector<8x16xi32>
    %5 = arith.addi %2, %4 : vector<8x16xi32>
    %6 = vector.broadcast %1 : vector<8x1xi32> to vector<8x16xi32>
    %7 = arith.cmpi eq, %5, %6 : vector<8x16xi32>
    %cst = arith.constant 0.000000e+00 : f32
    %8 = vector.broadcast %cst : f32 to vector<8x16xf32>
    %9 = arith.select %7, %0, %8 : vector<8x16xi1>, vector<8x16xf32>
    %cst_3 = arith.constant dense<0.000000e+00> : vector<8xf32>
    %10 = vector.multi_reduction <add>, %9, %cst_3 [1] : vector<8x16xf32> to vector<8xf32>
    %11 = vector.shape_cast %10 : vector<8xf32> to vector<8x1xf32>
    %cst_4 = arith.constant dense<0xFF800000> : vector<8xf32>
    %12 = vector.multi_reduction <maximumf>, %0, %cst_4 [1] : vector<8x16xf32> to vector<8xf32>
    %13 = vector.shape_cast %12 : vector<8xf32> to vector<8x1xf32>
    %c0_i32 = arith.constant 0 : i32
    %14 = arith.cmpi eq, %arg1, %c0_i32 : i32
    %15 = arith.extui %14 : i1 to i32
    %c0_i32_5 = arith.constant 0 : i32
    %16 = arith.cmpi ne, %15, %c0_i32_5 : i32
    scf.if %16 {
      %cst_21 = arith.constant 0xFF800000 : f32
      %37 = vector.broadcast %cst_21 : f32 to vector<8x1xf32>
      %c0_22 = arith.constant 0 : index
      %c0_23 = arith.constant 0 : index
      %38 = vector.load %arg5[%c0_22, %c0_23] : memref<8x1xf32, #tpu.memory_space<vmem>>, vector<8x1xf32>
      tpu.vector_store %arg5[%c0_22, %c0_23], %37 {strides = array<i32>} : memref<8x1xf32, #tpu.memory_space<vmem>>, vector<8x1xf32>,
      %cst_24 = arith.constant 0.000000e+00 : f32
      %39 = vector.broadcast %cst_24 : f32 to vector<8x1xf32>
      %c0_25 = arith.constant 0 : index
      %c0_26 = arith.constant 0 : index
      %40 = vector.load %arg6[%c0_25, %c0_26] : memref<8x1xf32, #tpu.memory_space<vmem>>, vector<8x1xf32>
      tpu.vector_store %arg6[%c0_25, %c0_26], %39 {strides = array<i32>} : memref<8x1xf32, #tpu.memory_space<vmem>>, vector<8x1xf32>,
      %cst_27 = arith.constant 0.000000e+00 : f32
      %41 = vector.broadcast %cst_27 : f32 to vector<8x1xf32>
      %c0_28 = arith.constant 0 : index
      %c0_29 = arith.constant 0 : index
      %42 = vector.load %arg7[%c0_28, %c0_29] : memref<8x1xf32, #tpu.memory_space<vmem>>, vector<8x1xf32>
      tpu.vector_store %arg7[%c0_28, %c0_29], %41 {strides = array<i32>} : memref<8x1xf32, #tpu.memory_space<vmem>>, vector<8x1xf32>,
    } else {
    }
    %c0_6 = arith.constant 0 : index
    %c0_7 = arith.constant 0 : index
    %17 = vector.load %arg5[%c0_6, %c0_7] : memref<8x1xf32, #tpu.memory_space<vmem>>, vector<8x1xf32>
    %18 = arith.maximumf %17, %13 : vector<8x1xf32>
    %19 = arith.subf %17, %18 : vector<8x1xf32>
    %20 = math.exp %19 : vector<8x1xf32>
    %c0_8 = arith.constant 0 : index
    %c0_9 = arith.constant 0 : index
    %21 = vector.load %arg6[%c0_8, %c0_9] : memref<8x1xf32, #tpu.memory_space<vmem>>, vector<8x1xf32>
    %22 = arith.mulf %21, %20 : vector<8x1xf32>
    %23 = vector.broadcast %18 : vector<8x1xf32> to vector<8x16xf32>
    %24 = arith.subf %0, %23 : vector<8x16xf32>
    %25 = math.exp %24 : vector<8x16xf32>
    %cst_10 = arith.constant dense<0.000000e+00> : vector<8xf32>
    %26 = vector.multi_reduction <add>, %25, %cst_10 [1] : vector<8x16xf32> to vector<8xf32>
    %27 = vector.shape_cast %26 : vector<8xf32> to vector<8x1xf32>
    %28 = arith.addf %22, %27 : vector<8x1xf32>
    %c0_11 = arith.constant 0 : index
    %c0_12 = arith.constant 0 : index
    %29 = vector.load %arg6[%c0_11, %c0_12] : memref<8x1xf32, #tpu.memory_space<vmem>>, vector<8x1xf32>
    tpu.vector_store %arg6[%c0_11, %c0_12], %28 {strides = array<i32>} : memref<8x1xf32, #tpu.memory_space<vmem>>, vector<8x1xf32>,
    %c0_13 = arith.constant 0 : index
    %c0_14 = arith.constant 0 : index
    %30 = vector.load %arg5[%c0_13, %c0_14] : memref<8x1xf32, #tpu.memory_space<vmem>>, vector<8x1xf32>
    tpu.vector_store %arg5[%c0_13, %c0_14], %18 {strides = array<i32>} : memref<8x1xf32, #tpu.memory_space<vmem>>, vector<8x1xf32>,
    %c0_15 = arith.constant 0 : index
    %c0_16 = arith.constant 0 : index
    %31 = vector.load %arg7[%c0_15, %c0_16] : memref<8x1xf32, #tpu.memory_space<vmem>>, vector<8x1xf32>
    %32 = arith.addf %31, %11 : vector<8x1xf32>
    %c0_17 = arith.constant 0 : index
    %c0_18 = arith.constant 0 : index
    %33 = vector.load %arg7[%c0_17, %c0_18] : memref<8x1xf32, #tpu.memory_space<vmem>>, vector<8x1xf32>
    tpu.vector_store %arg7[%c0_17, %c0_18], %32 {strides = array<i32>} : memref<8x1xf32, #tpu.memory_space<vmem>>, vector<8x1xf32>,
    %c0_i32_19 = arith.constant 0 : i32
    %34 = arith.cmpi eq, %arg1, %c0_i32_19 : i32
    %35 = arith.extui %34 : i1 to i32
    %c0_i32_20 = arith.constant 0 : i32
    %36 = arith.cmpi ne, %35, %c0_i32_20 : i32
    scf.if %36 {
      %c0_21 = arith.constant 0 : index
      %c0_22 = arith.constant 0 : index
      %37 = vector.load %arg6[%c0_21, %c0_22] : memref<8x1xf32, #tpu.memory_space<vmem>>, vector<8x1xf32>
      %38 = math.log %37 : vector<8x1xf32>
      %c0_23 = arith.constant 0 : index
      %c0_24 = arith.constant 0 : index
      %39 = vector.load %arg5[%c0_23, %c0_24] : memref<8x1xf32, #tpu.memory_space<vmem>>, vector<8x1xf32>
      %40 = arith.addf %38, %39 : vector<8x1xf32>
      %c0_25 = arith.constant 0 : index
      %c0_26 = arith.constant 0 : index
      %41 = vector.load %arg7[%c0_25, %c0_26] : memref<8x1xf32, #tpu.memory_space<vmem>>, vector<8x1xf32>
      %42 = arith.subf %40, %41 : vector<8x1xf32>
      %c-1_i32 = arith.constant -1 : i32
      %43 = vector.broadcast %c-1_i32 : i32 to vector<8x1xi32>
      %44 = arith.cmpi eq, %1, %43 : vector<8x1xi32>
      %cst_27 = arith.constant 0.000000e+00 : f32
      %45 = vector.broadcast %cst_27 : f32 to vector<8x1xf32>
      %46 = arith.select %44, %45, %42 : vector<8x1xi1>, vector<8x1xf32>
      %c0_28 = arith.constant 0 : index
      %c0_29 = arith.constant 0 : index
      %47 = vector.load %arg4[%c0_28, %c0_29] : memref<8x1xf32, #tpu.memory_space<vmem>>, vector<8x1xf32>
      tpu.vector_store %arg4[%c0_28, %c0_29], %46 {strides = array<i32>} : memref<8x1xf32, #tpu.memory_space<vmem>>, vector<8x1xf32>,
    } else {
    }
    return
  }
  func.func @transform_0(%arg0: i32, %arg1: i32) -> (i32, i32) {
    %c0_i32 = arith.constant 0 : i32
    return %arg0, %arg1 : i32, i32
  }
  func.func @transform_1(%arg0: i32, %arg1: i32) -> (i32, i32) {
    %c0_i32 = arith.constant 0 : i32
    %c0_i32_0 = arith.constant 0 : i32
    return %arg0, %c0_i32 : i32, i32
  }
  func.func @transform_2(%arg0: i32, %arg1: i32) -> (i32, i32) {
    %c0_i32 = arith.constant 0 : i32
    %c0_i32_0 = arith.constant 0 : i32
    return %arg0, %c0_i32 : i32, i32
  }
}

</mosaic_0001>

<bundles_post_ra>
// kernel: tpu_custom_call.1
= control target key start
LH: loop header
LB: loop body
LE: loop exit
PB: predicated region body
PF: predicated region fallthrough
CT: control target
= control target key end

     0   :  { %vm23_vm0 = vcmask 130048   ;;  %vm34_vm1 = vcmask 7168   ;;  %v91_v1 = vmov -inf   ;;  %v92_v3 = vmov 0   ;;  %s128_s0 = inlined_call_operand.vmem [shape: f32[8,16], index: 0, kind: input, shape index: {}]   ;;  %s129_s1 = inlined_call_operand.vmem [shape: s32[8,1], index: 1, kind: input, shape index: {}]   ;;  %s130_s2 = inlined_call_operand.vmem [shape: f32[8,1], index: 2, kind: output, shape index: {}]  }
   0x1   :  { %v11_v0 = vld [vmem:[%s128_s0] sm:$0xff]  ;;  %35 = vst.msk [vmem:[#allocation2] sm:$0xff] %vm34_vm1, %v91_v1  ;;  %83 = vset.pattern.permute.xlu0 %v92_v3  ;;  %84 = vset.pattern.permute.xlu1 %v92_v3  ;;  %v93_v4 = vmov 0.0   ;;  %v13_v10 = vlaneseq }
   0x2   :  { %v27_v2 = vsel %vm23_vm0, %v11_v0, -inf  ;;  %36 = vst.msk [vmem:[#allocation3] sm:$0xff] %vm34_vm1, %v93_v4  ;;  %v12_v5 = vld [vmem:[%s129_s1] sm:$0xff] }
   0x3   :  { %28 = vmax.xlane.f32.xlu0 %v27_v2  ;;  %37 = vst.msk [vmem:[#allocation4] sm:$0xff] %vm34_vm1, %v93_v4  ;;  %19 = vperm.xlu1 %84, %v12_v5   ;;  %v14_v12 = vand.u32 127, %v13_v10  ;;  %vm73_vm3 = vcmp.eq.s32.totalorder %v12_v5, 4294967295 }
   0x8   :  { %v38_v6 = vld [vmem:[#allocation2] sm:$0xff] }
   0x9   :  { %v43_v25 = vld [vmem:[#allocation3] sm:$0xff] }
   0xa   :  { %v60_v20 = vld [vmem:[#allocation4] sm:$0xff] }
  0x75   :  { %v20_v11 = vpop.permute.xlu1 %19 }
  0x76   :  { %v29_v7 = vpop.xlane.xlu0 %28  ;;  %vm21_vm2 = vcmp.eq.s32.totalorder %v14_v12, %v20_v11 }
  0x77   :  { %v39_v8 = vmax.f32 %v38_v6, %v29_v7  ;;  %v22_v13 = vsel %vm21_vm2, %v11_v0, 0.0 }
  0x78   :  { %v24_v14 = vsel %vm23_vm0, %v22_v13, 0.0 }
  0x79   :  { %v40_v9 = vsub.f32 %v38_v6, %v39_v8  ;;  %59 = vst.msk [vmem:[#allocation2] sm:$0xff] %vm34_vm1, %v39_v8  ;;  %47 = vperm.xlu0 %83, %v39_v8   ;;  %25 = vadd.xlane.f32.xlu2 %v24_v14 }
  0x7b   :  { %v41_v23 = vmul.f32 1.442695, %v40_v9 }
  0x80   :  { %v69_v32 = vld [vmem:[#allocation2] sm:$0xff] }
  0xeb   :  { %v48_v15 = vpop.permute.xlu0 %47 }
  0xec   :  { %v50_v16 = vsub.f32 %v11_v0, %v48_v15  ;;  %v26_v21 = vpop.xlane.xlu2 %25 }
  0xed   :  { %v61_v22 = vadd.f32 %v60_v20, %v26_v21 }
  0xee   :  { %v51_v17 = vmul.f32 1.442695, %v50_v16 }
  0xef   :  { %62 = vst.msk [vmem:[#allocation4] sm:$0xff] %vm34_vm1, %v61_v22 }
  0xf0   :  { %85 = vpow2.f32 %v51_v17 }
  0xf1   :  { %87 = vpow2.f32 %v41_v23 }
  0xf6   :  { %v86_v18 = vpop.eup %85  ;;  %v71_v33 = vld [vmem:[#allocation4] sm:$0xff] }
  0xf7   :  { %v53_v19 = vsel %vm23_vm0, %v86_v18, 0.0  ;;  %v88_v24 = vpop.eup %87 }
  0xf8   :  { %54 = vadd.xlane.f32.xlu1 %v53_v19  ;;  %v44_v26 = vmul.f32 %v88_v24, %v43_v25 }
 0x16b   :  { %v55_v27 = vpop.xlane.xlu1 %54 }
 0x16c   :  { %v56_v28 = vadd.f32 %v55_v27, %v44_v26 }
 0x16e   :  { %58 = vst.msk [vmem:[#allocation3] sm:$0xff] %vm34_vm1, %v56_v28 }
 0x175   :  { %v66_v29 = vld [vmem:[#allocation3] sm:$0xff] }
 0x176   :  { %89 = vlog2.f32 %v66_v29 }
 0x17c   :  { %v90_v30 = vpop.eup %89 }
 0x17d   :  { %v68_v31 = vmul.f32 0.6931472, %v90_v30 }
 0x17f   :  { %v70_v34 = vadd.f32 %v69_v32, %v68_v31 }
 0x181   :  { %v72_v35 = vsub.f32 %v70_v34, %v71_v33 }
 0x183   :  { %v74_v36 = vsel %vm73_vm3, 0.0, %v72_v35 }
 0x184   :  { %75 = vst.msk [vmem:[%s130_s2] sm:$0xff] %vm34_vm1, %v74_v36 }

</bundles_post_ra>
